<compile_context>
chip_gen: v7x
topology: tpu7x:2x2x1
jax: 0.10.0
libtpu: 0.0.40
codegen_flags: <defaults>
</compile_context>

<pallas_src>
import functools

import numpy as np
import jax
import jax.numpy as jnp
from jax.experimental import pallas as pl
from jax.experimental.pallas import tpu as pltpu


def _round_up(a, m):
    return (a + m - 1) // m * m


def _k_bucket(k):
    """Pad K to a power-of-two bucket (>= 2): one kernel compile per bucket."""
    return max(2, 1 << (int(k) - 1).bit_length())


def _block_diag(a, b):
    z_tr = jnp.zeros((a.shape[0], b.shape[1]), a.dtype)
    z_bl = jnp.zeros((b.shape[0], a.shape[1]), b.dtype)
    return jnp.concatenate(
        [jnp.concatenate([a, z_tr], axis=1),
         jnp.concatenate([z_bl, b], axis=1)], axis=0)


# ----------------------------------------------------------------------------
# Fused h/q encoder: block-diagonal weight stack, 5 matmuls for both branches
# ----------------------------------------------------------------------------
def _fused_encoder_kernel(x_ref, w0, b0, w1, b1, w2, b2, w3, b3, w4, b4,
                          out_ref):
    x = x_ref[...]                                   # [tr, x_dim]
    x_dim = x.shape[1]
    w0v = w0[...]

    # Layer 0 on the VPU: the contraction dim (x_dim, typically 2) is far too
    # small to be worth an MXU push/pop -> broadcast FMAs instead.
    acc = x[:, 0:1] * w0v[0:1, :]
    for d in range(1, x_dim):
        acc = acc + x[:, d:d + 1] * w0v[d:d + 1, :]
    z = jnp.maximum(acc + b0[...], 0.0)              # [tr, 2H] (128 lanes)

    def layer(v, w, b, relu=True):
        y = jnp.dot(v, w[...], preferred_element_type=jnp.float32) + b[...]
        return jnp.maximum(y, 0.0) if relu else y

    z = layer(z, w1, b1)
    z = layer(z, w2, b2)
    z = layer(z, w3, b3)
    out_ref[...] = layer(z, w4, b4, relu=False)      # [tr, 2*h_dim]


def _fuse_dual_encoder_params(h_params, q_params):
    (hw0, hb0, hw1, hb1, hw2, hb2, hw3, hb3, hw4, hb4) = h_params
    (qw0, qb0, qw1, qb1, qw2, qb2, qw3, qb3, qw4, qb4) = q_params
    fused = [jnp.concatenate([hw0, qw0], axis=1),
             jnp.concatenate([hb0, qb0], axis=1)]
    for hw, hb, qw, qb in ((hw1, hb1, qw1, qb1), (hw2, hb2, qw2, qb2),
                           (hw3, hb3, qw3, qb3), (hw4, hb4, qw4, qb4)):
        fused += [_block_diag(hw, qw), jnp.concatenate([hb, qb], axis=1)]
    return tuple(fused)


def encode_pallas(x, h_params, q_params, tile_rows=1024):
    """x: [M, x_dim] -> (hs, qs), each [M, h_dim].  One fused, row-tiled kernel."""
    M, x_dim = x.shape
    h_dim = h_params[-2].shape[1]
    out_dim = 2 * h_dim
    weights = _fuse_dual_encoder_params(h_params, q_params)

    if M <= tile_rows:
        tr = max(_round_up(M, 8), 8)
        m_pad = tr
    else:
        tr = tile_rows
        m_pad = _round_up(M, tr)
    if m_pad != M:
        x = jnp.concatenate([x, jnp.zeros((m_pad - M, x_dim), x.dtype)], axis=0)

    def _full(shape):
        nd = len(shape)
        return pl.BlockSpec(shape, lambda r, _nd=nd: (0,) * _nd)

    hq = pl.pallas_call(
        _fused_encoder_kernel,
        grid=(m_pad // tr,),
        in_specs=[pl.BlockSpec((tr, x_dim), lambda r: (r, 0))]
                 + [_full(w.shape) for w in weights],
        out_specs=pl.BlockSpec((tr, out_dim), lambda r: (r, 0)),
        out_shape=jax.ShapeDtypeStruct((m_pad, out_dim), jnp.float32),
        compiler_params=pltpu.CompilerParams(dimension_semantics=("parallel",)),
    )(x, *weights)
    return hq[:M, :h_dim], hq[:M, h_dim:]


# ----------------------------------------------------------------------------
# NeuralClustering.forward(cs, n) kernel: one batch block per grid step
# ----------------------------------------------------------------------------
def _ncp_forward_kernel(n_ref,
                        hs_ref, qs_ref, cs_ref,
                        gw0, gb0, gw1, gb1, gw2, gb2,
                        ew0g, ew0h, eb0, ew1, eb1, ew2t,
                        out_ref, *, k_pad):
    n = n_ref[0]
    hs = hs_ref[...]                       # [BB, N, h]  f32
    qs = qs_ref[...]                       # [BB, N, h]  f32
    cs = cs_ref[...]                       # [BB, N]     int32
    bb, npts, h_dim = hs.shape
    kp1 = k_pad + 1
    two_kp1 = 2 * k_pad + 1

    def dot_bf(a, w_ref):                  # bf16 operands, f32 accumulation
        return jnp.dot(a.astype(jnp.bfloat16), w_ref[...],
                       preferred_element_type=jnp.float32)

    # --- cs/n dependent masks, built in-kernel (n dynamic, K padded) ---------
    pt2 = jax.lax.broadcasted_iota(jnp.int32, (1, npts), 1)            # [1, N]
    pt3 = jax.lax.broadcasted_iota(jnp.int32, (1, npts, 1), 1)         # [1, N, 1]
    cs_mod = jnp.where(pt2 >= n, -1, cs)                               # [BB, N]

    k_iota = jax.lax.broadcasted_iota(jnp.int32, (1, k_pad, 1), 1)     # [1, Kp, 1]
    member = (cs_mod[:, None, :] == k_iota).astype(jnp.float32)        # [BB, Kp, N]
    present = jnp.max(member, axis=2)                                  # [BB, Kp]
    kb = jnp.max(cs_mod, axis=1, keepdims=True)                        # [BB, 1]

    sel_n = (pt3 == n).astype(jnp.float32)                             # [1, N, 1]
    unassigned = (pt3 >= n + 1).astype(jnp.float32)                    # [1, N, 1]

    # --- cluster sums H_k (bf16 MXU), point n, unassigned sum Q --------------
    hk = jnp.einsum('bkn,bnh->bkh', member.astype(jnp.bfloat16),
                    hs.astype(jnp.bfloat16),
                    preferred_element_type=jnp.float32)                # [BB, Kp, h]
    hn = jnp.sum(hs * sel_n, axis=1, keepdims=True)                    # [BB, 1, h]
    q_sum = jnp.sum(qs * unassigned, axis=1)                           # [BB, h]

    # --- g(.) MLP on row-stacked H: [BB*(2Kp+1), h] --------------------------
    hbig = jnp.concatenate([hk, hk + hn, hn], axis=1)                  # [BB, 2Kp+1, h]
    hflat = hbig.reshape(bb * two_kp1, h_dim)
    z = jnp.maximum(dot_bf(hflat, gw0) + gb0[...], 0.0)
    z = jnp.maximum(dot_bf(z, gw1) + gb1[...], 0.0)
    gs = dot_bf(z, gw2) + gb2[...]
    g_dim = gs.shape[-1]
    gs3 = gs.reshape(bb, two_kp1, g_dim)                               # [BB, 2Kp+1, g]

    # --- algebraic option combine (no selection tensor, no tiny matmul) ------
    gs_lo = gs3[:, :k_pad, :]              # g(H_k)
    gs_up = gs3[:, k_pad:2 * k_pad, :]     # g(H_k + h_n)
    gs_new = gs3[:, 2 * k_pad:, :]         # g(h_n)        [BB, 1, g]
    pres3 = present[:, :, None]            # [BB, Kp, 1]
    s_tot = jnp.sum(pres3 * gs_lo, axis=1, keepdims=True)              # [BB, 1, g]

    g_exist = pres3 * (s_tot - gs_lo + gs_up)                          # [BB, Kp, g]
    c_idx = jax.lax.broadcasted_iota(jnp.int32, (1, kp1, 1), 1)        # [1, Kp+1, 1]
    is_new = (c_idx == kb[:, :, None] + 1).astype(jnp.float32)         # [BB, Kp+1, 1]
    g_opts = (jnp.concatenate(
                  [g_exist, jnp.zeros((bb, 1, g_dim), jnp.float32)], axis=1)
              + is_new * (s_tot + gs_new))                             # [BB, Kp+1, g]

    # --- E(.) MLP; first layer split by rows so concat([G, Q]) disappears ----
    g_flat = g_opts.reshape(bb * kp1, g_dim)
    u0 = dot_bf(g_flat, ew0g)                                          # [BB*Kp+1, Hd]
    hd = u0.shape[-1]
    qc = dot_bf(q_sum, ew0h)                                           # [BB, Hd]
    u = jnp.maximum(u0.reshape(bb, kp1, hd) + qc[:, None, :] + eb0[...], 0.0)
    u = jnp.maximum(dot_bf(u.reshape(bb * kp1, hd), ew1) + eb1[...], 0.0)
    # last (bias-free, out_dim = 1) layer as a lane reduction on the VPU:
    e = jnp.sum(u.reshape(bb, kp1, hd) * ew2t[...][None, :, :], axis=-1)  # [BB, Kp+1]

    c2 = jax.lax.broadcasted_iota(jnp.int32, (1, kp1), 1)              # [1, Kp+1]
    gmask = (c2 <= kb + 1).astype(jnp.float32)                         # [BB, Kp+1]

    out_ref[...] = jnp.concatenate([e, gmask], axis=-1)                # [BB, 2(Kp+1)]


def _prep_forward_params(g_params, e_params, matmul_dtype=jnp.bfloat16):
    """Split / cast the g(.) and E(.) weights once, outside the kernel."""
    gw0, gb0, gw1, gb1, gw2, gb2 = g_params
    ew0, eb0, ew1, eb1, ew2 = e_params
    g_dim = gw2.shape[1]
    big_h = gw0.shape[1]
    md = matmul_dtype
    return (gw0.astype(md), gb0, gw1.astype(md), gb1, gw2.astype(md), gb2,
            ew0[:g_dim].astype(md),        # rows of E layer 0 acting on G ...
            ew0[g_dim:].astype(md),        # ... and on Q (kills the concat)
            eb0, ew1.astype(md), eb1,
            ew2.reshape(1, big_h))         # bias-free last layer, transposed


def _pick_batch_block(batch, max_block_b):
    """Target >= 2 grid steps when possible (v7x megacore) under the 8-row rule."""
    if batch <= 8:
        return batch, batch                # single block; bb == b_pad is legal
    bb = min(_round_up(max_block_b, 8), max(8, _round_up((batch + 1) // 2, 8)))
    return bb, _round_up(batch, bb)


def _fwd_vmem_limit(bb, npts, h_dim, g_dim, big_h, k_pad):
    """Raise the scoped VMEM limit only when the double-buffered blocks need it."""
    blk = 2 * (2 * bb * npts * h_dim * 4          # hs + qs (f32, double-buffered)
               + bb * npts * 4                    # cs
               + bb * 2 * (k_pad + 1) * 4)        # packed output
    wts = 2 * (2 * h_dim * big_h + 2 * big_h * big_h + 2 * big_h * g_dim) \
        + 4 * (6 * big_h + g_dim + big_h)
    need = blk + wts
    if need <= 24 * 1024 * 1024:
        return None                               # compiler default is plenty
    return min(2 * need, 48 * 1024 * 1024)


@functools.lru_cache(maxsize=None)
def _build_ncp_forward_call(b_pad, bb, npts, h_dim, g_dim, big_h, k_pad,
                            vmem_limit):
    """Build (and cache) one compiled forward kernel per static configuration."""
    kp1 = k_pad + 1
    kernel = functools.partial(_ncp_forward_kernel, k_pad=k_pad)

    def _batched(shape):
        nd = len(shape)
        return pl.BlockSpec(shape, lambda b, s, _nd=nd: (b,) + (0,) * (_nd - 1))

    def _full(shape):
        nd = len(shape)
        return pl.BlockSpec(shape, lambda b, s, _nd=nd: (0,) * _nd)

    w_shapes = [
        (h_dim, big_h), (1, big_h), (big_h, big_h), (1, big_h),
        (big_h, g_dim), (1, g_dim),                                   # g(.)
        (g_dim, big_h), (h_dim, big_h), (1, big_h),
        (big_h, big_h), (1, big_h), (1, big_h),                       # E(.)
    ]
    in_specs = [
        _batched((bb, npts, h_dim)),        # hs
        _batched((bb, npts, h_dim)),        # qs
        _batched((bb, npts)),               # cs (int32)
    ] + [_full(s) for s in w_shapes]

    grid_spec = pltpu.PrefetchScalarGridSpec(
        num_scalar_prefetch=1,              # n
        grid=(b_pad // bb,),
        in_specs=in_specs,
        out_specs=_batched((bb, 2 * kp1)),  # packed [E | G_mask]
    )
    call = pl.pallas_call(
        kernel,
        grid_spec=grid_spec,
        out_shape=jax.ShapeDtypeStruct((b_pad, 2 * kp1), jnp.float32),
        compiler_params=pltpu.CompilerParams(
            dimension_semantics=("parallel",),
            vmem_limit_bytes=vmem_limit),
    )
    return jax.jit(call)


def ncp_forward_padded(hs, qs, cs, n, prepped_weights, *, k_pad, max_block_b=16):
    """Device-side NCP forward: cs [B, N] int32 on device, n a (traced) scalar,
    K fixed to the k_pad bucket.  Returns (E_pad [B, Kp+1], G_mask [B, Kp+1]);
    entries past each row's kb+1 option carry mask 0.  Safe to call inside a
    jitted lax.scan over n (no host sync / recompiles across steps)."""
    B, N, h_dim = hs.shape
    big_h = prepped_weights[0].shape[1]
    g_dim = prepped_weights[4].shape[1]
    kp1 = k_pad + 1

    bb, b_pad = _pick_batch_block(B, max_block_b)
    if b_pad != B:
        # NOTE: for a sequential sampling loop, pre-pad once outside the loop
        # (or pick B compatible with bb) so this copy does not run per step.
        pad = b_pad - B
        hs = jnp.concatenate([hs, jnp.zeros((pad, N, h_dim), hs.dtype)], axis=0)
        qs = jnp.concatenate([qs, jnp.zeros((pad, N, h_dim), qs.dtype)], axis=0)
        cs = jnp.concatenate([cs, jnp.zeros((pad, N), cs.dtype)], axis=0)

    vmem_limit = _fwd_vmem_limit(bb, N, h_dim, g_dim, big_h, k_pad)
    call = _build_ncp_forward_call(b_pad, bb, N, h_dim, g_dim, big_h, k_pad,
                                   vmem_limit)
    n_arr = jnp.reshape(jnp.asarray(n, dtype=jnp.int32), (1,))
    out = call(n_arr, hs, qs, cs, *prepped_weights)
    return out[:B, :kp1], out[:B, kp1:]


def ncp_forward_pallas(hs, qs, cs, n, g_params, e_params, max_block_b=16):
    """NeuralClustering.forward(cs, n) -> (E [B, K+1], G_mask [B, K+1]).

    Convenience path (derives K on the host, slices the padded outputs).
    For the sequential sampling loop use ncp_forward_padded inside one jit."""
    cs = np.asarray(cs)
    if cs.ndim < 2:
        cs = cs[None, :]
    B, N, _ = hs.shape
    n = int(n)
    assert 0 < n < N, "forward requires 0 < n < N"
    K = int(cs[:, :n].max()) + 1
    k_pad = _k_bucket(K)
    cs_full = jnp.asarray(
        np.ascontiguousarray(np.broadcast_to(cs.astype(np.int32), (B, N))))
    prepped = _prep_forward_params(g_params, e_params)
    e_pad, gm_pad = ncp_forward_padded(hs, qs, cs_full, n, prepped,
                                       k_pad=k_pad, max_block_b=max_block_b)
    return e_pad[:, :K + 1], gm_pad[:, :K + 1]


# ----------------------------------------------------------------------------
# Plain-numpy reference (literal transcription of the PyTorch code)
# ----------------------------------------------------------------------------
def _ref_encoder(x, p):
    z = np.asarray(x)
    p = [np.asarray(a) for a in p]
    for i in range(4):
        z = np.maximum(z @ p[2 * i] + p[2 * i + 1], 0.0)
    return z @ p[8] + p[9]


def _ref_forward(hs, qs, cs, n, g_params, e_params):
    hs, qs = np.asarray(hs), np.asarray(qs)
    cs = np.asarray(cs)
    if cs.ndim < 2:
        cs = cs[None, :]
    B, N, h_dim = hs.shape
    gw0, gb0, gw1, gb1, gw2, gb2 = [np.asarray(a) for a in g_params]
    ew0, eb0, ew1, eb1, ew2 = [np.asarray(a) for a in e_params]
    g_dim = gw2.shape[1]

    def g_fn(x):
        z = np.maximum(x @ gw0 + gb0, 0.0)
        z = np.maximum(z @ gw1 + gb1, 0.0)
        return z @ gw2 + gb2

    def E_fn(x):
        z = np.maximum(x @ ew0 + eb0, 0.0)
        z = np.maximum(z @ ew1 + eb1, 0.0)
        return z @ ew2

    K = int(cs[:, :n].max()) + 1
    cs2 = cs.copy()
    cs2[:, n:] = -1
    many = cs2.shape[0] > 1
    H = np.zeros((B, 2 * K + 1, h_dim), np.float32)
    G = np.zeros((B, K + 1, g_dim), np.float32)
    if many:
        Ks = cs2.max(axis=1)
        gs_mask = np.zeros((B, 2 * K + 1, 1), np.float32)
    for k in range(K):
        m = (cs2 == k).astype(np.float32)[:, :, None]
        H[:, k, :] = (hs * m).sum(1)
        H[:, k + K, :] = H[:, k, :] + hs[:, n, :]
        if many:
            gs_mask[:, k] = (cs2 == k).any(axis=1, keepdims=True)
            gs_mask[:, k + K] = gs_mask[:, k]
    H[:, 2 * K, :] = hs[:, n, :]
    if many:
        gs_mask[:, 2 * K] = 1.0
    gs = g_fn(H.reshape(B * (2 * K + 1), h_dim)).reshape(B, 2 * K + 1, g_dim)
    if many:
        gs = gs_mask * gs
    for k in range(K):
        inds = np.array([True] * K + [False] * (K + 1))
        inds[k] = False
        inds[k + K] = True
        G[:, k, :] = gs[:, inds, :].sum(1)
    inds = np.array([True] * K + [False] * K + [True])
    G[:, K, :] = gs[:, inds, :].sum(1)
    if many:
        G[:, :K] = G[:, :K] * gs_mask[:, :K]
    G_mask = np.ones((B, K + 1), np.float32)
    if many:
        for k in range(K - 1):
            which_k = Ks == k
            G[which_k, k + 1, :] = G[which_k, -1, :]
            G[which_k, -1, :] = 0.0
            G_mask[which_k, k + 2:] = 0.0
    Q = qs[:, n + 1:].sum(axis=1)
    Qe = np.broadcast_to(Q[:, None, :], (B, K + 1, h_dim))
    uu = np.concatenate([G, Qe], axis=2).reshape(B * (K + 1), g_dim + h_dim)
    E = E_fn(uu).reshape(B, K + 1)
    return E, G_mask


# ----------------------------------------------------------------------------
# Deterministic parameter init
# ----------------------------------------------------------------------------
def _init_linear(key, din, dout, bias=True):
    kw, kb = jax.random.split(key)
    lim = 1.0 / np.sqrt(din)
    w = jax.random.uniform(kw, (din, dout), jnp.float32, -lim, lim)
    if not bias:
        return w, None
    b = jax.random.uniform(kb, (1, dout), jnp.float32, -lim, lim)
    return w, b


def _init_encoder(key, x_dim, Hd, h_dim):
    keys = jax.random.split(key, 5)
    dims = [(x_dim, Hd), (Hd, Hd), (Hd, Hd), (Hd, Hd), (Hd, h_dim)]
    p = []
    for k, (di, do) in zip(keys, dims):
        w, b = _init_linear(k, di, do)
        p += [w, b]
    return tuple(p)


def _init_fc(key, din, Hd, dout, last_layer_bias=True):
    k0, k1, k2 = jax.random.split(key, 3)
    w0, b0 = _init_linear(k0, din, Hd)
    w1, b1 = _init_linear(k1, Hd, Hd)
    w2, b2 = _init_linear(k2, Hd, dout, bias=last_layer_bias)
    if last_layer_bias:
        return (w0, b0, w1, b1, w2, b2)
    return (w0, b0, w1, b1, w2)


# ----------------------------------------------------------------------------
if __name__ == "__main__":
    params = dict(x_dim=2, H_dim=64, h_dim=32, g_dim=32)
    B, N = 2, 8
    x_dim, Hd, h_dim, g_dim = (params["x_dim"], params["H_dim"],
                               params["h_dim"], params["g_dim"])

    key = jax.random.PRNGKey(0)
    kdata, kh, kq, kg, ke = jax.random.split(key, 5)

    data = jax.random.normal(kdata, (B, N, x_dim), jnp.float32)   # Gauss2D pts
    h_enc = _init_encoder(kh, x_dim, Hd, h_dim)                   # self.h
    q_enc = _init_encoder(kq, x_dim, Hd, h_dim)                   # self.q
    g_params = _init_fc(kg, h_dim, Hd, g_dim, last_layer_bias=True)       # g(.)
    e_params = _init_fc(ke, g_dim + h_dim, Hd, 1, last_layer_bias=False)  # E(.)

    # NeuralClustering.encode : hs, qs = [B, N, h_dim] (fused block-diag kernel)
    flat = data.reshape(B * N, x_dim)
    hs_flat, qs_flat = encode_pallas(flat, h_enc, q_enc)
    jax.block_until_ready((hs_flat, qs_flat))
    np.testing.assert_allclose(np.asarray(hs_flat), _ref_encoder(flat, h_enc),
                               rtol=1e-2, atol=1e-2)
    np.testing.assert_allclose(np.asarray(qs_flat), _ref_encoder(flat, q_enc),
                               rtol=1e-2, atol=1e-2)
    hs = hs_flat.reshape(B, N, h_dim)
    qs = qs_flat.reshape(B, N, h_dim)

    n = 5
    # bf16 matmul operands (f32 accumulation) in the forward kernel -> compare
    # against the f32 reference with a slightly looser tolerance.
    TOL = dict(rtol=2e-2, atol=2e-2)

    # Case 1: ground-truth labels, cs shape [1, N]  (single-pattern path)
    cs_gt = np.array([[0, 0, 1, 1, 2, 0, 1, 2]], np.int32)
    E1, Gm1 = ncp_forward_pallas(hs, qs, cs_gt, n, g_params, e_params)
    jax.block_until_ready(E1)
    E1_ref, Gm1_ref = _ref_forward(hs, qs, cs_gt, n, g_params, e_params)
    np.testing.assert_allclose(np.asarray(E1), E1_ref, **TOL)
    np.testing.assert_allclose(np.asarray(Gm1), Gm1_ref)

    # Case 2: per-sample assignments, cs shape [B, N]  (many-pattern path)
    cs_smp = np.array([[0, 1, 1, 0, 2, 0, 0, 0],
                       [0, 0, 0, 1, 0, 0, 0, 0]], np.int32)
    E2, Gm2 = ncp_forward_pallas(hs, qs, cs_smp, n, g_params, e_params)
    jax.block_until_ready(E2)
    E2_ref, Gm2_ref = _ref_forward(hs, qs, cs_smp, n, g_params, e_params)
    np.testing.assert_allclose(np.asarray(E2), E2_ref, **TOL)
    np.testing.assert_allclose(np.asarray(Gm2), Gm2_ref)

    # Case 3: the whole sequential n-loop (n = 1..N-1) inside ONE jit, with cs
    # on device, a fixed K bucket and n fed through scalar prefetch -> no
    # per-step host sync, recompile or re-padding.
    k_pad_loop = _k_bucket(int(cs_gt.max()) + 1)
    prepped = _prep_forward_params(g_params, e_params)
    cs_dev = jnp.asarray(np.ascontiguousarray(
        np.broadcast_to(cs_gt.astype(np.int32), (B, N))))

    @jax.jit
    def all_steps(hs_, qs_, cs_, weights_):
        def step(carry, n_val):
            e_pad, gm_pad = ncp_forward_padded(hs_, qs_, cs_, n_val, weights_,
                                               k_pad=k_pad_loop)
            return carry, (e_pad, gm_pad)
        return jax.lax.scan(step, 0, jnp.arange(1, N, dtype=jnp.int32))[1]

    E_all, Gm_all = all_steps(hs, qs, cs_dev, prepped)
    jax.block_until_ready((E_all, Gm_all))
    for idx, nn in enumerate(range(1, N)):
        E_ref, Gm_ref = _ref_forward(hs, qs, cs_gt, nn, g_params, e_params)
        kn = E_ref.shape[1]
        np.testing.assert_allclose(np.asarray(E_all[idx][:, :kn]) * Gm_ref,
                                   E_ref * Gm_ref, **TOL)
        np.testing.assert_allclose(np.asarray(Gm_all[idx][:, :kn]), Gm_ref)
        np.testing.assert_allclose(np.asarray(Gm_all[idx][:, kn:]), 0.0)

    print("KERNEL_OK")
</pallas_src>

<mosaic_0001>
module attributes {stable_mosaic.version = 11 : i64} {
  func.func @_fused_encoder_kernel(%arg0: i32, %arg1: memref<16x2xf32, #tpu.memory_space<vmem>>, %arg2: memref<2x128xf32, #tpu.memory_space<vmem>>, %arg3: memref<1x128xf32, #tpu.memory_space<vmem>>, %arg4: memref<128x128xf32, #tpu.memory_space<vmem>>, %arg5: memref<1x128xf32, #tpu.memory_space<vmem>>, %arg6: memref<128x128xf32, #tpu.memory_space<vmem>>, %arg7: memref<1x128xf32, #tpu.memory_space<vmem>>, %arg8: memref<128x128xf32, #tpu.memory_space<vmem>>, %arg9: memref<1x128xf32, #tpu.memory_space<vmem>>, %arg10: memref<128x64xf32, #tpu.memory_space<vmem>>, %arg11: memref<1x64xf32, #tpu.memory_space<vmem>>, %arg12: memref<16x64xf32, #tpu.memory_space<vmem>>) attributes {dimension_semantics = [#tpu.dimension_semantics<parallel>], iteration_bounds = array<i64: 1>, scalar_prefetch = 0 : i64, scratch_operands = 0 : i64, tpu.core_type = #tpu.core_type<tc>, window_params = [{transform_indices = @transform_0, window_bounds = array<i64: 16, 2>}, {pipeline_mode = #tpu.pipeline_mode<synchronous>, transform_indices = @transform_1, window_bounds = array<i64: 2, 128>}, {pipeline_mode = #tpu.pipeline_mode<synchronous>, transform_indices = @transform_2, window_bounds = array<i64: 1, 128>}, {pipeline_mode = #tpu.pipeline_mode<synchronous>, transform_indices = @transform_3, window_bounds = array<i64: 128, 128>}, {pipeline_mode = #tpu.pipeline_mode<synchronous>, transform_indices = @transform_4, window_bounds = array<i64: 1, 128>}, {pipeline_mode = #tpu.pipeline_mode<synchronous>, transform_indices = @transform_5, window_bounds = array<i64: 128, 128>}, {pipeline_mode = #tpu.pipeline_mode<synchronous>, transform_indices = @transform_6, window_bounds = array<i64: 1, 128>}, {pipeline_mode = #tpu.pipeline_mode<synchronous>, transform_indices = @transform_7, window_bounds = array<i64: 128, 128>}, {pipeline_mode = #tpu.pipeline_mode<synchronous>, transform_indices = @transform_8, window_bounds = array<i64: 1, 128>}, {pipeline_mode = #tpu.pipeline_mode<synchronous>, transform_indices = @transform_9, window_bounds = array<i64: 128, 64>}, {pipeline_mode = #tpu.pipeline_mode<synchronous>, transform_indices = @transform_10, window_bounds = array<i64: 1, 64>}, {transform_indices = @transform_11, window_bounds = array<i64: 16, 64>}]} {
    %c0 = arith.constant 0 : index
    %c0_0 = arith.constant 0 : index
    %0 = vector.load %arg1[%c0, %c0_0] : memref<16x2xf32, #tpu.memory_space<vmem>>, vector<16x2xf32>
    %c0_1 = arith.constant 0 : index
    %c0_2 = arith.constant 0 : index
    %1 = vector.load %arg2[%c0_1, %c0_2] : memref<2x128xf32, #tpu.memory_space<vmem>>, vector<2x128xf32>
    %2 = vector.extract_strided_slice %0 {offsets = [0, 0], sizes = [16, 1], strides = [1, 1]} : vector<16x2xf32> to vector<16x1xf32>
    %3 = vector.extract_strided_slice %1 {offsets = [0, 0], sizes = [1, 128], strides = [1, 1]} : vector<2x128xf32> to vector<1x128xf32>
    %4 = vector.broadcast %2 : vector<16x1xf32> to vector<16x128xf32>
    %5 = vector.broadcast %3 : vector<1x128xf32> to vector<16x128xf32>
    %6 = arith.mulf %4, %5 : vector<16x128xf32>
    %7 = vector.extract_strided_slice %0 {offsets = [0, 1], sizes = [16, 1], strides = [1, 1]} : vector<16x2xf32> to vector<16x1xf32>
    %8 = vector.extract_strided_slice %1 {offsets = [1, 0], sizes = [1, 128], strides = [1, 1]} : vector<2x128xf32> to vector<1x128xf32>
    %9 = vector.broadcast %7 : vector<16x1xf32> to vector<16x128xf32>
    %10 = vector.broadcast %8 : vector<1x128xf32> to vector<16x128xf32>
    %11 = arith.mulf %9, %10 : vector<16x128xf32>
    %12 = arith.addf %6, %11 : vector<16x128xf32>
    %c0_3 = arith.constant 0 : index
    %c0_4 = arith.constant 0 : index
    %13 = vector.load %arg3[%c0_3, %c0_4] : memref<1x128xf32, #tpu.memory_space<vmem>>, vector<1x128xf32>
    %14 = vector.broadcast %13 : vector<1x128xf32> to vector<16x128xf32>
    %15 = arith.addf %12, %14 : vector<16x128xf32>
    %cst = arith.constant 0.000000e+00 : f32
    %16 = vector.broadcast %cst : f32 to vector<16x128xf32>
    %17 = arith.maximumf %15, %16 : vector<16x128xf32>
    %c0_5 = arith.constant 0 : index
    %c0_6 = arith.constant 0 : index
    %18 = vector.load %arg4[%c0_5, %c0_6] : memref<128x128xf32, #tpu.memory_space<vmem>>, vector<128x128xf32>
    %cst_7 = arith.constant dense<0.000000e+00> : vector<16x128xf32>
    %19 = tpu.matmul %17, %18, %cst_7 {dimension_numbers = #tpu.dot_dimension_numbers<[1], [0], [0], [1], [0, 0, 1, 1], [], []>} : vector<16x128xf32>, vector<128x128xf32>, vector<16x128xf32> -> vector<16x128xf32>
    %c0_8 = arith.constant 0 : index
    %c0_9 = arith.constant 0 : index
    %20 = vector.load %arg5[%c0_8, %c0_9] : memref<1x128xf32, #tpu.memory_space<vmem>>, vector<1x128xf32>
    %21 = vector.broadcast %20 : vector<1x128xf32> to vector<16x128xf32>
    %22 = arith.addf %19, %21 : vector<16x128xf32>
    %cst_10 = arith.constant 0.000000e+00 : f32
    %23 = vector.broadcast %cst_10 : f32 to vector<16x128xf32>
    %24 = arith.maximumf %22, %23 : vector<16x128xf32>
    %c0_11 = arith.constant 0 : index
    %c0_12 = arith.constant 0 : index
    %25 = vector.load %arg6[%c0_11, %c0_12] : memref<128x128xf32, #tpu.memory_space<vmem>>, vector<128x128xf32>
    %cst_13 = arith.constant dense<0.000000e+00> : vector<16x128xf32>
    %26 = tpu.matmul %24, %25, %cst_13 {dimension_numbers = #tpu.dot_dimension_numbers<[1], [0], [0], [1], [0, 0, 1, 1], [], []>} : vector<16x128xf32>, vector<128x128xf32>, vector<16x128xf32> -> vector<16x128xf32>
    %c0_14 = arith.constant 0 : index
    %c0_15 = arith.constant 0 : index
    %27 = vector.load %arg7[%c0_14, %c0_15] : memref<1x128xf32, #tpu.memory_space<vmem>>, vector<1x128xf32>
    %28 = vector.broadcast %27 : vector<1x128xf32> to vector<16x128xf32>
    %29 = arith.addf %26, %28 : vector<16x128xf32>
    %cst_16 = arith.constant 0.000000e+00 : f32
    %30 = vector.broadcast %cst_16 : f32 to vector<16x128xf32>
    %31 = arith.maximumf %29, %30 : vector<16x128xf32>
    %c0_17 = arith.constant 0 : index
    %c0_18 = arith.constant 0 : index
    %32 = vector.load %arg8[%c0_17, %c0_18] : memref<128x128xf32, #tpu.memory_space<vmem>>, vector<128x128xf32>
    %cst_19 = arith.constant dense<0.000000e+00> : vector<16x128xf32>
    %33 = tpu.matmul %31, %32, %cst_19 {dimension_numbers = #tpu.dot_dimension_numbers<[1], [0], [0], [1], [0, 0, 1, 1], [], []>} : vector<16x128xf32>, vector<128x128xf32>, vector<16x128xf32> -> vector<16x128xf32>
    %c0_20 = arith.constant 0 : index
    %c0_21 = arith.constant 0 : index
    %34 = vector.load %arg9[%c0_20, %c0_21] : memref<1x128xf32, #tpu.memory_space<vmem>>, vector<1x128xf32>
    %35 = vector.broadcast %34 : vector<1x128xf32> to vector<16x128xf32>
    %36 = arith.addf %33, %35 : vector<16x128xf32>
    %cst_22 = arith.constant 0.000000e+00 : f32
    %37 = vector.broadcast %cst_22 : f32 to vector<16x128xf32>
    %38 = arith.maximumf %36, %37 : vector<16x128xf32>
    %c0_23 = arith.constant 0 : index
    %c0_24 = arith.constant 0 : index
    %39 = vector.load %arg10[%c0_23, %c0_24] : memref<128x64xf32, #tpu.memory_space<vmem>>, vector<128x64xf32>
    %cst_25 = arith.constant dense<0.000000e+00> : vector<16x64xf32>
    %40 = tpu.matmul %38, %39, %cst_25 {dimension_numbers = #tpu.dot_dimension_numbers<[1], [0], [0], [1], [0, 0, 1, 1], [], []>} : vector<16x128xf32>, vector<128x64xf32>, vector<16x64xf32> -> vector<16x64xf32>
    %c0_26 = arith.constant 0 : index
    %c0_27 = arith.constant 0 : index
    %41 = vector.load %arg11[%c0_26, %c0_27] : memref<1x64xf32, #tpu.memory_space<vmem>>, vector<1x64xf32>
    %42 = vector.broadcast %41 : vector<1x64xf32> to vector<16x64xf32>
    %43 = arith.addf %40, %42 : vector<16x64xf32>
    %c0_28 = arith.constant 0 : index
    %c0_29 = arith.constant 0 : index
    %44 = vector.load %arg12[%c0_28, %c0_29] : memref<16x64xf32, #tpu.memory_space<vmem>>, vector<16x64xf32>
    tpu.vector_store %arg12[%c0_28, %c0_29], %43 {strides = array<i32>} : memref<16x64xf32, #tpu.memory_space<vmem>>, vector<16x64xf32>,
    return
  }
  func.func @transform_0(%arg0: i32) -> (i32, i32) {
    %c0_i32 = arith.constant 0 : i32
    %c0_i32_0 = arith.constant 0 : i32
    return %arg0, %c0_i32 : i32, i32
  }
  func.func @transform_1(%arg0: i32) -> (i32, i32) {
    %c0_i32 = arith.constant 0 : i32
    %c0_i32_0 = arith.constant 0 : i32
    %c0_i32_1 = arith.constant 0 : i32
    return %c0_i32, %c0_i32_0 : i32, i32
  }
  func.func @transform_2(%arg0: i32) -> (i32, i32) {
    %c0_i32 = arith.constant 0 : i32
    %c0_i32_0 = arith.constant 0 : i32
    %c0_i32_1 = arith.constant 0 : i32
    return %c0_i32, %c0_i32_0 : i32, i32
  }
  func.func @transform_3(%arg0: i32) -> (i32, i32) {
    %c0_i32 = arith.constant 0 : i32
    %c0_i32_0 = arith.constant 0 : i32
    %c0_i32_1 = arith.constant 0 : i32
    return %c0_i32, %c0_i32_0 : i32, i32
  }
  func.func @transform_4(%arg0: i32) -> (i32, i32) {
    %c0_i32 = arith.constant 0 : i32
    %c0_i32_0 = arith.constant 0 : i32
    %c0_i32_1 = arith.constant 0 : i32
    return %c0_i32, %c0_i32_0 : i32, i32
  }
  func.func @transform_5(%arg0: i32) -> (i32, i32) {
    %c0_i32 = arith.constant 0 : i32
    %c0_i32_0 = arith.constant 0 : i32
    %c0_i32_1 = arith.constant 0 : i32
    return %c0_i32, %c0_i32_0 : i32, i32
  }
  func.func @transform_6(%arg0: i32) -> (i32, i32) {
    %c0_i32 = arith.constant 0 : i32
    %c0_i32_0 = arith.constant 0 : i32
    %c0_i32_1 = arith.constant 0 : i32
    return %c0_i32, %c0_i32_0 : i32, i32
  }
  func.func @transform_7(%arg0: i32) -> (i32, i32) {
    %c0_i32 = arith.constant 0 : i32
    %c0_i32_0 = arith.constant 0 : i32
    %c0_i32_1 = arith.constant 0 : i32
    return %c0_i32, %c0_i32_0 : i32, i32
  }
  func.func @transform_8(%arg0: i32) -> (i32, i32) {
    %c0_i32 = arith.constant 0 : i32
    %c0_i32_0 = arith.constant 0 : i32
    %c0_i32_1 = arith.constant 0 : i32
    return %c0_i32, %c0_i32_0 : i32, i32
  }
  func.func @transform_9(%arg0: i32) -> (i32, i32) {
    %c0_i32 = arith.constant 0 : i32
    %c0_i32_0 = arith.constant 0 : i32
    %c0_i32_1 = arith.constant 0 : i32
    return %c0_i32, %c0_i32_0 : i32, i32
  }
  func.func @transform_10(%arg0: i32) -> (i32, i32) {
    %c0_i32 = arith.constant 0 : i32
    %c0_i32_0 = arith.constant 0 : i32
    %c0_i32_1 = arith.constant 0 : i32
    return %c0_i32, %c0_i32_0 : i32, i32
  }
  func.func @transform_11(%arg0: i32) -> (i32, i32) {
    %c0_i32 = arith.constant 0 : i32
    %c0_i32_0 = arith.constant 0 : i32
    return %arg0, %c0_i32 : i32, i32
  }
}

</mosaic_0001>

<bundles_post_ra>
// kernel: tpu_custom_call.1
= control target key start
LH: loop header
LB: loop body
LE: loop exit
PB: predicated region body
PF: predicated region fallthrough
CT: control target
= control target key end

     0   :  { %16 = vsyncpa [#allocation3], 0  ;;  %s1192_s0 = inlined_call_operand.vmem [shape: f32[16,2], index: 0, kind: input, shape index: {}]   ;;  %s1193_s1 = inlined_call_operand.vmem [shape: f32[2,128], index: 1, kind: input, shape index: {}]   ;;  %s1194_s2 = inlined_call_operand.vmem [shape: f32[1,128], index: 2, kind: input, shape index: {}]   ;;  %s1195_s3 = inlined_call_operand.vmem [shape: f32[128,128], index: 3, kind: input, shape index: {}]   ;;  %s1196_s4 = inlined_call_operand.vmem [shape: f32[1,128], index: 4, kind: input, shape index: {}]   ;;  %s1197_s5 = inlined_call_operand.hbm [shape: f32[128,128], index: 5, kind: input, shape index: {}]   ;;  %s1198_s6 = inlined_call_operand.vmem [shape: f32[1,128], index: 6, kind: input, shape index: {}]   ;;  %s1199_s7 = inlined_call_operand.hbm [shape: f32[128,128], index: 7, kind: input, shape index: {}]   ;;  %s1200_s8 = inlined_call_operand.vmem [shape: f32[1,128], index: 8, kind: input, shape index: {}]   ;;  %s1201_s9 = inlined_call_operand.vmem [shape: f32[128,64], index: 9, kind: input, shape index: {}]   ;;  %s1202_s10 = inlined_call_operand.vmem [shape: f32[1,64], index: 10, kind: input, shape index: {}]   ;;  %s1203_s11 = inlined_call_operand.hbm [shape: f32[16,64], index: 11, kind: output, shape index: {}]  }
   0x1   :  { %17 = vsyncpa [#allocation6], 0 }
   0x2   :  { %18 = vsyncpa [#allocation4], 0  ;;  %s960_s17 = smov [#allocation2]   ;;  %s888_s21 = scalar_lea.hbm %s1197_s5, 2048 }
   0x3   :  { %s34_s18 = sshll.u32 %s960_s17, 4  ;;  %p889_p0 = scmp.ne.s32.totalorder %s1197_s5, %s888_s21  ;;  %s35_s18 = int_to_ptr.vmem [resolvable:$true] %s34_s18 }
   0x4   :  { %p892_p1 = scmp.lt.u32.totalorder %s888_s21, %s1197_s5 }
   0x6   :  { %p894_p2 = pnand %p892_p1, %p889_p0 }
   0x8   :  { %897 = shalt.err (!%p894_p2)
}
   0x9   :  { %s898_s26 = scalar_lea.vmem %s35_s18, 2048  ;;  %p903_p4 = scmp.lt.s32.totalorder %s35_s18, %s35_s18 }
   0xa   :  { %p899_p3 = scmp.ne.s32.totalorder %s35_s18, %s898_s26  ;;  %p904_p5 = scmp.lt.s32.totalorder %s898_s26, %s898_s26 }
   0xc   :  { %p905_p6 = por %p904_p5, %p903_p4 }
   0xe   :  { %p906_p7 = pnand %p905_p6, %p899_p3 }
  0x10   :  { %909 = shalt.err (!%p906_p7)
}
  0x11   :  { %s961_s27 = smov 128   ;;  %s962_s28 = smov 8  }
  0x12   :  { %40 = dma.hbm_to_vmem [thread:$0]  %s1197_s5, 2048, %s35_s18, [#allocation3], %s961_s27, %s961_s27, %s962_s28  }
  0x13   :  { %s963_s12 = smov [#allocation5]   ;;  %s910_s16 = scalar_lea.hbm %s1199_s7, 2048 }
  0x14   :  { %s48_s13 = sshll.u32 %s963_s12, 4  ;;  %p911_p8 = scmp.ne.s32.totalorder %s1199_s7, %s910_s16  ;;  %s49_s13 = int_to_ptr.vmem [resolvable:$true] %s48_s13 }
  0x15   :  { %p914_p9 = scmp.lt.u32.totalorder %s910_s16, %s1199_s7 }
  0x17   :  { %p916_p10 = pnand %p914_p9, %p911_p8 }
  0x19   :  { %919 = shalt.err (!%p916_p10)
}
  0x1a   :  { %s920_s22 = scalar_lea.vmem %s49_s13, 2048  ;;  %p925_p12 = scmp.lt.s32.totalorder %s49_s13, %s49_s13 }
  0x1b   :  { %p921_p11 = scmp.ne.s32.totalorder %s49_s13, %s920_s22  ;;  %p926_p13 = scmp.lt.s32.totalorder %s920_s22, %s920_s22 }
  0x1d   :  { %p927_p0 = por %p926_p13, %p925_p12 }
  0x1f   :  { %p928_p1 = pnand %p927_p0, %p921_p11 }
  0x21   :  { %931 = shalt.err (!%p928_p1)
}
  0x22   :  { %54 = dma.hbm_to_vmem [thread:$0]  %s1199_s7, 2048, %s49_s13, [#allocation6], %s961_s27, %s961_s27, %s962_s28  }
  0x23   :  { %954 = dma.done.wait [#allocation3], 2048  }
  0x24   :  { %955 = vsyncadd [#allocation3], 4294965248 }
  0x25   :  { %956 = dma.done.wait [#allocation6], 2048  }
  0x26   :  { %957 = vsyncadd [#allocation6], 4294965248  ;;  %v964_v0 = vmov 0   ;;  %v68_v1 = vld [vmem:[%s1192_s0 + $0x8] sm:$0xff]  ;;  %v67_v2 = vld [vmem:[%s1192_s0] sm:$0xff]  ;;  %v965_v9 = vmov 1   ;;  %v80_v49 = vlaneseq }
  0x27   :  { %886 = vset.pattern.permute.xlu1 %v964_v0  ;;  %884 = vset.pattern.permute.xlu0 %v964_v0  ;;  %v113_v3 = vld [vmem:[%s1195_s3] sm:$0xff]  ;;  %v114_v4 = vld [vmem:[%s1195_s3 + $0x8] sm:$0xff]  ;;  %v115_v5 = vld [vmem:[%s1195_s3 + $0x10] sm:$0xff]  ;;  %vm511_vm0 = vcmask 523264  }
  0x28   :  { %77 = vperm.xlu1 %886, %v68_v1   ;;  %72 = vperm.xlu0 %884, %v67_v2   ;;  %v116_v6 = vld [vmem:[%s1195_s3 + $0x18] sm:$0xff]  ;;  %v749_v7 = vpack.c.bf16 %v114_v4, %v113_v3  ;;  %v117_v10 = vld [vmem:[%s1195_s3 + $0x20] sm:$0xff]  ;;  %v118_v11 = vld [vmem:[%s1195_s3 + $0x28] sm:$0xff]  ;;  %v81_v50 = vshrl.u32 %v80_v49, 7 }
  0x29   :  { %v753_v8 = vpack.c.bf16 %v116_v6, %v115_v5  ;;  %v757_v12 = vpack.c.bf16 %v118_v11, %v117_v10  ;;  %v119_v13 = vld [vmem:[%s1195_s3 + $0x30] sm:$0xff]  ;;  %v120_v14 = vld [vmem:[%s1195_s3 + $0x38] sm:$0xff]  ;;  %v121_v16 = vld [vmem:[%s1195_s3 + $0x40] sm:$0xff] }
  0x2a   :  { %750 = vmatprep.subr.bf16.mxu0 %v749_v7  ;;  %v761_v15 = vpack.c.bf16 %v120_v14, %v119_v13  ;;  %v122_v17 = vld [vmem:[%s1195_s3 + $0x48] sm:$0xff]  ;;  %v213_v18 = vld [vmem:[#allocation2] sm:$0xff]  ;;  %v215_v20 = vld [vmem:[#allocation2 + $0x10] sm:$0xff]  ;;  %v82_v51 = vsub.s32 0, %v81_v50  ;;  %v96_v52 = vsub.s32 1, %v81_v50 }
  0x2b   :  { %752 = vmatpush3.bf16.msra.mxu0 %v749_v7  ;;  %v214_v19 = vld [vmem:[#allocation2 + $0x8] sm:$0xff]  ;;  %v765_v21 = vpack.c.bf16 %v122_v17, %v121_v16  ;;  %v123_v22 = vld [vmem:[%s1195_s3 + $0x50] sm:$0xff]  ;;  %v216_v24 = vld [vmem:[#allocation2 + $0x18] sm:$0xff] }
  0x2c   :  { %887 = vset.pattern.permute.xlu1 %v965_v9  ;;  %885 = vset.pattern.permute.xlu0 %v965_v9  ;;  %v781_v23 = vpack.c.bf16 %v214_v19, %v213_v18  ;;  %v124_v25 = vld [vmem:[%s1195_s3 + $0x58] sm:$0xff]  ;;  %v785_v26 = vpack.c.bf16 %v216_v24, %v215_v20  ;;  %v217_v27 = vld [vmem:[#allocation2 + $0x20] sm:$0xff]  ;;  %v218_v28 = vld [vmem:[#allocation2 + $0x28] sm:$0xff] }
  0x2d   :  { %91 = vperm.xlu1 %887, %v68_v1   ;;  %87 = vperm.xlu0 %885, %v67_v2   ;;  %v769_v29 = vpack.c.bf16 %v124_v25, %v123_v22  ;;  %v125_v30 = vld [vmem:[%s1195_s3 + $0x60] sm:$0xff]  ;;  %v789_v31 = vpack.c.bf16 %v218_v28, %v217_v27  ;;  %v126_v32 = vld [vmem:[%s1195_s3 + $0x68] sm:$0xff]  ;;  %v219_v33 = vld [vmem:[#allocation2 + $0x30] sm:$0xff] }
  0x2e   :  { %754 = vmatprep.subr.bf16.mxu0 %v753_v8  ;;  %782 = vmatprep.subr.bf16.mxu1 %v781_v23  ;;  %v220_v34 = vld [vmem:[#allocation2 + $0x38] sm:$0xff]  ;;  %v773_v35 = vpack.c.bf16 %v126_v32, %v125_v30  ;;  %v127_v36 = vld [vmem:[%s1195_s3 + $0x70] sm:$0xff]  ;;  %v221_v39 = vld [vmem:[#allocation2 + $0x40] sm:$0xff] }
  0x2f   :  { %756 = vmatpush3.bf16.msra.mxu0 %v753_v8  ;;  %784 = vmatpush3.bf16.msra.mxu1 %v781_v23  ;;  %v793_v37 = vpack.c.bf16 %v220_v34, %v219_v33  ;;  %v128_v38 = vld [vmem:[%s1195_s3 + $0x78] sm:$0xff]  ;;  %v222_v40 = vld [vmem:[#allocation2 + $0x48] sm:$0xff]  ;;  %v223_v43 = vld [vmem:[#allocation2 + $0x50] sm:$0xff] }
  0x30   :  { %758 = vmatprep.subr.bf16.mxu0 %v757_v12  ;;  %786 = vmatprep.subr.bf16.mxu1 %v785_v26  ;;  %v777_v41 = vpack.c.bf16 %v128_v38, %v127_v36  ;;  %v797_v42 = vpack.c.bf16 %v222_v40, %v221_v39  ;;  %v224_v44 = vld [vmem:[#allocation2 + $0x58] sm:$0xff]  ;;  %v225_v46 = vld [vmem:[#allocation2 + $0x60] sm:$0xff]  ;;  %v226_v47 = vld [vmem:[#allocation2 + $0x68] sm:$0xff] }
  0x31   :  { %v801_v45 = vpack.c.bf16 %v224_v44, %v223_v43  ;;  %v805_v48 = vpack.c.bf16 %v226_v47, %v225_v46  ;;  %v69_v53 = vld [vmem:[%s1193_s1] sm:$0x3]  ;;  %v227_v7 = vld [vmem:[#allocation2 + $0x70] sm:$0xff]  ;;  %v228_v8 = vld [vmem:[#allocation2 + $0x78] sm:$0xff] }
  0x32   :  { %v83_v56 = vrot.slane %v69_v53, %v82_v51  ;;  %v97_v57 = vrot.slane %v69_v53, %v96_v52  ;;  %v532_v0 = vld [vmem:[%s1194_s2] ss:$0 sm:$0xff]  ;;  %v809_v9 = vpack.c.bf16 %v228_v8, %v227_v7  ;;  %v314_v11 = vld [vmem:[#allocation5 + $0x8] sm:$0xff]  ;;  %v316_v14 = vld [vmem:[#allocation5 + $0x18] sm:$0xff] }
  0x33   :  { %760 = vmatpush3.bf16.msra.mxu0 %v757_v12  ;;  %788 = vmatpush3.bf16.msra.mxu1 %v785_v26  ;;  %v313_v10 = vld [vmem:[#allocation5] sm:$0xff]  ;;  %v315_v12 = vld [vmem:[#allocation5 + $0x10] sm:$0xff]  ;;  %v318_v17 = vld [vmem:[#allocation5 + $0x28] sm:$0xff] }
  0x34   :  { %762 = vmatprep.subr.bf16.mxu0 %v761_v15  ;;  %790 = vmatprep.subr.bf16.mxu1 %v789_v31  ;;  %v813_v13 = vpack.c.bf16 %v314_v11, %v313_v10  ;;  %v317_v16 = vld [vmem:[#allocation5 + $0x20] sm:$0xff]  ;;  %v319_v19 = vld [vmem:[#allocation5 + $0x30] sm:$0xff]  ;;  %v320_v20 = vld [vmem:[#allocation5 + $0x38] sm:$0xff] }
  0x35   :  { %v821_v18 = vpack.c.bf16 %v318_v17, %v317_v16  ;;  %v321_v22 = vld [vmem:[#allocation5 + $0x40] sm:$0xff]  ;;  %v322_v23 = vld [vmem:[#allocation5 + $0x48] sm:$0xff]  ;;  %v323_v25 = vld [vmem:[#allocation5 + $0x50] sm:$0xff] }
  0x36   :  { %v829_v24 = vpack.c.bf16 %v322_v23, %v321_v22  ;;  %v324_v26 = vld [vmem:[#allocation5 + $0x58] sm:$0xff]  ;;  %v325_v28 = vld [vmem:[#allocation5 + $0x60] sm:$0xff]  ;;  %v327_v38 = vld [vmem:[#allocation5 + $0x70] sm:$0xff] }
  0x37   :  { %764 = vmatpush3.bf16.msra.mxu0 %v761_v15  ;;  %792 = vmatpush3.bf16.msra.mxu1 %v789_v31  ;;  %v817_v15 = vpack.c.bf16 %v316_v14, %v315_v12  ;;  %v833_v27 = vpack.c.bf16 %v324_v26, %v323_v25  ;;  %v533_v31 = vld [vmem:[%s1196_s4] ss:$0 sm:$0xff]  ;;  %v328_v39 = vld [vmem:[#allocation5 + $0x78] sm:$0xff]  ;;  %v415_v43 = vld [vmem:[%s1201_s9 + $0x10] sm:$0xff] }
  0x38   :  { %766 = vmatprep.subr.bf16.mxu0 %v765_v21  ;;  %794 = vmatprep.subr.bf16.mxu1 %v793_v37  ;;  %v841_v40 = vpack.c.bf16 %v328_v39, %v327_v38  ;;  %v417_v47 = vld [vmem:[%s1201_s9 + $0x20] sm:$0xff]  ;;  %v419_v50 = vld [vmem:[%s1201_s9 + $0x30] sm:$0xff]  ;;  %v420_v51 = vld [vmem:[%s1201_s9 + $0x38] sm:$0xff] }
  0x39   :  { %v857_v52 = vpack.c.bf16 %v420_v51, %v419_v50  ;;  %v421_v53 = vld [vmem:[%s1201_s9 + $0x40] sm:$0xff] }
  0x3a   :  { %v535_v8 = vld [vmem:[%s1200_s8] ss:$0 sm:$0xff] }
  0x3b   :  { %768 = vmatpush3.bf16.msra.mxu0 %v765_v21  ;;  %796 = vmatpush3.bf16.msra.mxu1 %v793_v37  ;;  %v825_v21 = vpack.c.bf16 %v320_v20, %v319_v19 }
  0x3c   :  { %770 = vmatprep.subr.bf16.mxu0 %v769_v29  ;;  %798 = vmatprep.subr.bf16.mxu1 %v797_v42 }
  0x3f   :  { %772 = vmatpush3.bf16.msra.mxu0 %v769_v29  ;;  %800 = vmatpush3.bf16.msra.mxu1 %v797_v42  ;;  %v326_v29 = vld [vmem:[#allocation5 + $0x68] sm:$0xff] }
  0x40   :  { %774 = vmatprep.subr.bf16.mxu0 %v773_v35  ;;  %802 = vmatprep.subr.bf16.mxu1 %v801_v45  ;;  %v837_v30 = vpack.c.bf16 %v326_v29, %v325_v28  ;;  %v414_v42 = vld [vmem:[%s1201_s9 + $0x8] sm:$0xff] }
  0x43   :  { %776 = vmatpush3.bf16.msra.mxu0 %v773_v35  ;;  %804 = vmatpush3.bf16.msra.mxu1 %v801_v45  ;;  %v416_v45 = vld [vmem:[%s1201_s9 + $0x18] sm:$0xff] }
  0x44   :  { %778 = vmatprep.subr.bf16.mxu0 %v777_v41  ;;  %806 = vmatprep.subr.bf16.mxu1 %v805_v48  ;;  %v849_v46 = vpack.c.bf16 %v416_v45, %v415_v43 }
  0x47   :  { %780 = vmatpush3.bf16.msra.mxu0 %v777_v41  ;;  %808 = vmatpush3.bf16.msra.mxu1 %v805_v48  ;;  %v413_v41 = vld [vmem:[%s1201_s9] sm:$0xff]  ;;  %v418_v48 = vld [vmem:[%s1201_s9 + $0x28] sm:$0xff] }
  0x48   :  { %810 = vmatprep.subr.bf16.mxu1 %v809_v9  ;;  %814 = vmatprep.subr.bf16.mxu0 %v813_v13  ;;  %v845_v44 = vpack.c.bf16 %v414_v42, %v413_v41  ;;  %v853_v49 = vpack.c.bf16 %v418_v48, %v417_v47 }
  0x4b   :  { %812 = vmatpush3.bf16.msra.mxu1 %v809_v9 }
  0x4c   :  { %846 = vmatprep.subr.bf16.mxu1 %v845_v44 }
  0xa7   :  { %v73_v54 = vpop.permute.xlu0 %72  ;;  %v78_v55 = vpop.permute.xlu1 %77 }
  0xa8   :  { %v84_v60 = vmul.f32 %v83_v56, %v73_v54  ;;  %v85_v61 = vmul.f32 %v83_v56, %v78_v55  ;;  %v422_v54 = vld [vmem:[%s1201_s9 + $0x48] sm:$0xff]  ;;  %v423_v56 = vld [vmem:[%s1201_s9 + $0x50] sm:$0xff] }
  0xa9   :  { %v861_v55 = vpack.c.bf16 %v422_v54, %v421_v53 }
  0xac   :  { %v92_v58 = vpop.permute.xlu1 %91  ;;  %v88_v59 = vpop.permute.xlu0 %87 }
  0xad   :  { %v99_v62 = vmul.f32 %v97_v57, %v92_v58  ;;  %v98_v63 = vmul.f32 %v97_v57, %v88_v59  ;;  %v424_v57 = vld [vmem:[%s1201_s9 + $0x58] sm:$0xff]  ;;  %v425_v59 = vld [vmem:[%s1201_s9 + $0x60] sm:$0xff] }
  0xae   :  { %v865_v58 = vpack.c.bf16 %v424_v57, %v423_v56 }
  0xaf   :  { %v101_v1 = vadd.f32 %v99_v62, %v85_v61  ;;  %v100_v2 = vadd.f32 %v98_v63, %v84_v60  ;;  %v426_v60 = vld [vmem:[%s1201_s9 + $0x68] sm:$0xff]  ;;  %v534_v62 = vld [vmem:[%s1198_s6] ss:$0 sm:$0xff] }
  0xb0   :  { %v869_v61 = vpack.c.bf16 %v426_v60, %v425_v59 }
  0xb1   :  { %v109_v3 = vadd.f32 %v532_v0, %v100_v2  ;;  %v110_v4 = vadd.f32 %v532_v0, %v101_v1 }
  0xb3   :  { %v111_v5 = vmax.f32 %v109_v3, 0.0  ;;  %v112_v6 = vmax.f32 %v110_v4, 0.0 }
  0xb5   :  { %641 = vmatprep.mubr.f32.mxu0 %v111_v5  ;;  %v427_v5 = vld [vmem:[%s1201_s9 + $0x70] sm:$0xff] }
  0xb6   :  { %642 = vmatmul.mubr.f32.vlgmr.msra.gmra.mrb[0].mxu0 %v112_v6  ;;  %v428_v6 = vld [vmem:[%s1201_s9 + $0x78] sm:$0xff]  ;;  %s966_s9 = smov [#allocation7]  }
  0xb7   :  { %816 = vmatpush3.bf16.msra.mxu0 %v813_v13  ;;  %v873_v7 = vpack.c.bf16 %v428_v6, %v427_v5  ;;  %s519_s16 = sshll.u32 %s966_s9, 4  ;;  %s520_s16 = int_to_ptr.vmem [resolvable:$true] %s519_s16 }
  0xb8   :  { %818 = vmatprep.subr.bf16.mxu0 %v817_v15  ;;  %s932_s8 = scalar_lea.vmem %s520_s16, 256  ;;  %p937_p3 = scmp.lt.s32.totalorder %s520_s16, %s520_s16 }
  0xb9   :  { %p933_p2 = scmp.ne.s32.totalorder %s520_s16, %s932_s8  ;;  %p938_p4 = scmp.lt.s32.totalorder %s932_s8, %s932_s8 }
  0xbb   :  { %820 = vmatpush3.bf16.msra.mxu0 %v817_v15  ;;  %v536_v15 = vld [vmem:[%s1202_s10] ss:$0 sm:$0xff]  ;;  %p939_p5 = por %p938_p4, %p937_p3 }
  0xbc   :  { %822 = vmatprep.subr.bf16.mxu0 %v821_v18 }
  0xbd   :  { %p940_p6 = pnand %p939_p5, %p933_p2 }
  0xbf   :  { %824 = vmatpush3.bf16.msra.mxu0 %v821_v18 }
  0xc0   :  { %826 = vmatprep.subr.bf16.mxu0 %v825_v21 }
  0xc3   :  { %828 = vmatpush3.bf16.msra.mxu0 %v825_v21 }
  0xc4   :  { %830 = vmatprep.subr.bf16.mxu0 %v829_v24 }
  0xc7   :  { %832 = vmatpush3.bf16.msra.mxu0 %v829_v24 }
  0xc8   :  { %834 = vmatprep.subr.bf16.mxu0 %v833_v27 }
  0xcb   :  { %836 = vmatpush3.bf16.msra.mxu0 %v833_v27 }
  0xcc   :  { %838 = vmatprep.subr.bf16.mxu0 %v837_v30 }
  0xcf   :  { %840 = vmatpush3.bf16.msra.mxu0 %v837_v30 }
  0xd0   :  { %842 = vmatprep.subr.bf16.mxu0 %v841_v40 }
  0xd3   :  { %844 = vmatpush3.bf16.msra.mxu0 %v841_v40 }
 0x189   :  { %v643_v32 = vpop.f32.mrb[0].mxu0 }
 0x18a   :  { %v208_v33 = vadd.f32 %v643_v32, %v533_v31  ;;  %v202_v34 = vpop.f32.mrb[1].mxu0 }
 0x18b   :  { %v203_v35 = vadd.f32 %v533_v31, %v202_v34 }
 0x18c   :  { %v212_v37 = vmax.f32 %v208_v33, 0.0 }
 0x18d   :  { %v211_v36 = vmax.f32 %v203_v35, 0.0 }
 0x18f   :  { %676 = vmatprep.mubr.f32.mxu1 %v211_v36 }
 0x190   :  { %677 = vmatmul.mubr.f32.vlgmr.msra.gmra.mrb[0].mxu1 %v212_v37 }
 0x191   :  { %848 = vmatpush3.bf16.msra.mxu1 %v845_v44 }
 0x192   :  { %850 = vmatprep.subr.bf16.mxu1 %v849_v46 }
 0x195   :  { %852 = vmatpush3.bf16.msra.mxu1 %v849_v46 }
 0x196   :  { %854 = vmatprep.subr.bf16.mxu1 %v853_v49 }
 0x199   :  { %856 = vmatpush3.bf16.msra.mxu1 %v853_v49 }
 0x19a   :  { %858 = vmatprep.subr.bf16.mxu1 %v857_v52 }
 0x19d   :  { %860 = vmatpush3.bf16.msra.mxu1 %v857_v52 }
 0x19e   :  { %862 = vmatprep.subr.bf16.mxu1 %v861_v55 }
 0x1a1   :  { %864 = vmatpush3.bf16.msra.mxu1 %v861_v55 }
 0x1a2   :  { %866 = vmatprep.subr.bf16.mxu1 %v865_v58 }
 0x1a5   :  { %868 = vmatpush3.bf16.msra.mxu1 %v865_v58 }
 0x1a6   :  { %870 = vmatprep.subr.bf16.mxu1 %v869_v61 }
 0x1a9   :  { %872 = vmatpush3.bf16.msra.mxu1 %v869_v61 }
 0x1aa   :  { %874 = vmatprep.subr.bf16.mxu1 %v873_v7 }
 0x1ad   :  { %876 = vmatpush3.bf16.msra.mxu1 %v873_v7 }
 0x263   :  { %v678_v63 = vpop.f32.mrb[0].mxu1 }
 0x264   :  { %v308_v0 = vadd.f32 %v678_v63, %v534_v62  ;;  %v302_v1 = vpop.f32.mrb[1].mxu1 }
 0x265   :  { %v303_v2 = vadd.f32 %v534_v62, %v302_v1 }
 0x266   :  { %v312_v4 = vmax.f32 %v308_v0, 0.0 }
 0x267   :  { %v311_v3 = vmax.f32 %v303_v2, 0.0 }
 0x269   :  { %711 = vmatprep.mubr.f32.mxu0 %v311_v3 }
 0x26a   :  { %712 = vmatmul.mubr.f32.vlgmr.msra.gmra.mrb[2].mxu0 %v312_v4 }
 0x33d   :  { %v713_v9 = vpop.f32.mrb[2].mxu0 }
 0x33e   :  { %v408_v10 = vadd.f32 %v713_v9, %v535_v8  ;;  %v402_v11 = vpop.f32.mrb[3].mxu0 }
 0x33f   :  { %v403_v12 = vadd.f32 %v535_v8, %v402_v11 }
 0x340   :  { %v412_v14 = vmax.f32 %v408_v10, 0.0 }
 0x341   :  { %v411_v13 = vmax.f32 %v403_v12, 0.0 }
 0x343   :  { %746 = vmatprep.mubr.f32.mxu1 %v411_v13 }
 0x344   :  { %747 = vmatmul.mubr.f32.vlgmr.msra.gmra.mrb[2].mxu1 %v412_v14 }
 0x417   :  { %v748_v16 = vpop.f32.mrb[2].mxu1 }
 0x418   :  { %v508_v17 = vadd.f32 %v748_v16, %v536_v15  ;;  %v502_v18 = vpop.f32.mrb[3].mxu1 }
 0x419   :  { %v503_v19 = vadd.f32 %v536_v15, %v502_v18 }
 0x41a   :  { %513 = vst.msk [vmem:[#allocation7 + $0x8] sm:$0xff] %vm511_vm0, %v508_v17 }
 0x41b   :  { %512 = vst.msk [vmem:[#allocation7] sm:$0xff] %vm511_vm0, %v503_v19 }
 0x41c   :  { %943 = shalt.err (!%p940_p6)
}
 0x41d   :  { %s944_s10 = scalar_lea.hbm %s1203_s11, 256 }
 0x41e   :  { %p945_p7 = scmp.ne.s32.totalorder %s1203_s11, %s944_s10  ;;  %p948_p8 = scmp.lt.u32.totalorder %s944_s10, %s1203_s11 }
 0x420   :  { %p950_p9 = pnand %p948_p8, %p945_p7 }
 0x422   :  { %953 = shalt.err (!%p950_p9)
}
 0x423   :  { %525 = dma.vmem_to_hbm [thread:$0]  %s520_s16, 256, %s1203_s11, [#allocation4], %s961_s27, %s961_s27, %s962_s28  }
 0x424   :  { %958 = dma.done.wait [#allocation4], 256  }
 0x425   :  { %959 = vsyncadd [#allocation4], 4294967040 }
 0x426   :  { %529 = vsyncpa [#allocation3], 1 }
 0x427   :  { %530 = vsyncpa [#allocation6], 1 }
 0x428   :  { %531 = vsyncpa [#allocation4], 1 }

</bundles_post_ra>
